<compile_context>
chip_gen: v6e
topology: v6e:2x2x1
jax: 0.10.0
libtpu: 0.0.40
codegen_flags: <defaults>
</compile_context>

<pallas_src>
import math

import jax
import jax.numpy as jnp
from jax import lax
from jax.experimental import pallas as pl
from jax.experimental.pallas import tpu as pltpu


def _stable_softplus(x):
    # log(1 + exp(x)) without overflow for large x (matches F.softplus).
    return jnp.maximum(x, 0.0) + jnp.log1p(jnp.exp(-jnp.abs(x)))


def _linear_bayes_kernel(tile_flags_ref,                      # scalar-prefetch (SMEM)
                         x_ref, mu_w_ref, rho_w_ref, eps_w_ref, bias_ref,  # inputs
                         o_ref,                               # output
                         acc_ref, w_ref):                     # VMEM scratch
    j = pl.program_id(1)        # n_out tile index
    kk = pl.program_id(2)       # n_in reduction tile index

    @pl.when(kk == 0)
    def _():
        acc_ref[...] = jnp.zeros_like(acc_ref)

    # ---- sample the weight tile (reparameterization trick) ----
    # The is_bayes_w mask is already folded into eps_w (exact: mask is 0/1).
    # Skip the transcendentals on tiles with no Bayesian rows at all.
    tile_is_bayes = tile_flags_ref[j] > 0

    @pl.when(tile_is_bayes)
    def _():
        rho = rho_w_ref[...]
        sigma = _stable_softplus(rho)
        w_ref[...] = mu_w_ref[...] + sigma * eps_w_ref[...]

    @pl.when(jnp.logical_not(tile_is_bayes))
    def _():
        w_ref[...] = mu_w_ref[...]

    # ---- y += x @ W^T, without materializing a transpose ----
    acc_ref[...] += lax.dot_general(
        x_ref[...], w_ref[...],
        dimension_numbers=(((1,), (1,)), ((), ())),
        preferred_element_type=jnp.float32,
    )

    # ---- finalize: sample bias and write lane-dense output ----
    @pl.when(kk == pl.num_programs(2) - 1)
    def _():
        mu_b = bias_ref[0:1, :]                 # (1, TN)
        rho_b = bias_ref[1:2, :]
        eps_b = bias_ref[2:3, :]                # already masked by is_bayes_b
        bias = mu_b + _stable_softplus(rho_b) * eps_b
        o_ref[...] = (acc_ref[...] + bias).astype(o_ref.dtype)


def _round_up(x, m):
    return ((x + m - 1) // m) * m


def linear_bayes_forward(x, mu_w, rho_w, eps_w, is_bayes_w,
                         mu_b, rho_b, eps_b, is_bayes_b,
                         *, tile_b=None, tile_n=None, tile_k=None):
    """Bayesian linear forward pass (sampling + matmul + bias) in one Pallas kernel.

    x:          (B, n_in)        float32
    mu_w/rho_w/eps_w: (n_out, n_in) float32
    is_bayes_w: (n_out, 1) or (n_out,)  0/1 float32
    mu_b/rho_b/eps_b/is_bayes_b: (n_out,) float32
    returns:    (B, n_out) float32
    """
    B, n_in = x.shape
    n_out = mu_w.shape[0]
    f32 = jnp.float32

    # Tile sizes: lane-dense output tiles (multiple of 128), conservative VMEM
    # footprint (fits v7x's 64 MiB with double-buffered mu/rho/eps tiles).
    TB = tile_b or min(128, _round_up(B, 8))
    TN = tile_n or min(256, _round_up(n_out, 128))
    TK = tile_k or min(512, _round_up(n_in, 128))

    Bp = _round_up(B, TB)
    Np = _round_up(n_out, TN)
    Kp = _round_up(n_in, TK)

    # ---- pad / preprocess on the host (layout plumbing only) ----
    x_p = jnp.zeros((Bp, Kp), f32).at[:B, :n_in].set(x.astype(f32))
    mu_w_p = jnp.zeros((Np, Kp), f32).at[:n_out, :n_in].set(mu_w.astype(f32))
    rho_w_p = jnp.zeros((Np, Kp), f32).at[:n_out, :n_in].set(rho_w.astype(f32))

    is_bw_col = is_bayes_w.reshape(n_out, 1).astype(f32)
    eps_w_eff = (eps_w.astype(f32) * is_bw_col)           # fold 0/1 mask (exact)
    eps_w_p = jnp.zeros((Np, Kp), f32).at[:n_out, :n_in].set(eps_w_eff)

    # Fused bias params, padded to 8 sublanes: rows = [mu_b, rho_b, eps_b*mask].
    bias_fused = jnp.zeros((8, Np), f32)
    bias_fused = bias_fused.at[0, :n_out].set(mu_b.astype(f32))
    bias_fused = bias_fused.at[1, :n_out].set(rho_b.astype(f32))
    bias_fused = bias_fused.at[2, :n_out].set(
        (eps_b.astype(f32) * is_bayes_b.reshape(n_out).astype(f32)))

    # Per-n_out-tile flag: does this tile contain ANY Bayesian row?
    n_tiles_n = Np // TN
    mask_p = jnp.zeros((Np,), f32).at[:n_out].set(is_bayes_w.reshape(n_out).astype(f32))
    tile_flags = (mask_p.reshape(n_tiles_n, TN).sum(axis=1) > 0).astype(jnp.int32)

    grid = (Bp // TB, n_tiles_n, Kp // TK)

    out = pl.pallas_call(
        _linear_bayes_kernel,
        out_shape=jax.ShapeDtypeStruct((Bp, Np), f32),
        grid_spec=pltpu.PrefetchScalarGridSpec(
            num_scalar_prefetch=1,
            grid=grid,
            in_specs=[
                pl.BlockSpec((TB, TK), lambda i, j, k, flags: (i, k)),   # x
                pl.BlockSpec((TN, TK), lambda i, j, k, flags: (j, k)),   # mu_w
                pl.BlockSpec((TN, TK), lambda i, j, k, flags: (j, k)),   # rho_w
                pl.BlockSpec((TN, TK), lambda i, j, k, flags: (j, k)),   # eps_w (masked)
                pl.BlockSpec((8, TN), lambda i, j, k, flags: (0, j)),    # fused bias params
            ],
            out_specs=pl.BlockSpec((TB, TN), lambda i, j, k, flags: (i, j)),
            scratch_shapes=[
                pltpu.VMEM((TB, TN), jnp.float32),   # f32 accumulator
                pltpu.VMEM((TN, TK), jnp.float32),   # sampled weight tile
            ],
        ),
        compiler_params=pltpu.CompilerParams(
            dimension_semantics=("parallel", "parallel", "arbitrary"),
            vmem_limit_bytes=32 * 1024 * 1024,
        ),
    )(tile_flags, x_p, mu_w_p, rho_w_p, eps_w_p, bias_fused)

    return out[:B, :n_out]


def init_linear_bayes_params(key, n_in, n_out,
                             mu_w_prior=0.0, rho_w_prior=-1.0,
                             mu_b_prior=0.0, rho_b_prior=-1.0,
                             bayes_factor_w=1, bayes_factor_b=1):
    """Deterministic parameter init mirroring LinearBayes.__init__ (scalar priors)."""
    init_scale = 1.0 / jnp.sqrt(jnp.asarray(float(n_in)))
    k_w, = jax.random.split(key, 1)
    mu_w = mu_w_prior + init_scale * (jax.random.uniform(k_w, (n_out, n_in)) - 0.5)
    rho_w = rho_w_prior * jnp.ones((n_out, n_in), jnp.float32)
    mu_b = mu_b_prior + jnp.zeros((n_out,), jnp.float32)
    rho_b = rho_b_prior * jnp.ones((n_out,), jnp.float32)

    if bayes_factor_w <= 1:
        bayes_factor_w = math.ceil(bayes_factor_w * n_out)
    if bayes_factor_b <= 1:
        bayes_factor_b = math.ceil(bayes_factor_b * n_out)
    is_bayes_w = jnp.zeros((n_out, 1), jnp.float32)
    is_bayes_b = jnp.zeros((n_out,), jnp.float32)
    if bayes_factor_w != 0:
        is_bayes_w = is_bayes_w.at[:bayes_factor_w].set(1.0)
    if bayes_factor_b != 0:
        is_bayes_b = is_bayes_b.at[:bayes_factor_b].set(1.0)
    return mu_w, rho_w, mu_b, rho_b, is_bayes_w, is_bayes_b


def _reference(x, mu_w, rho_w, eps_w, is_bw, mu_b, rho_b, eps_b, is_bb):
    sp = jax.nn.softplus
    w = mu_w + sp(rho_w) * eps_w * is_bw
    b = mu_b + sp(rho_b) * eps_b * is_bb
    return x @ w.T + b


if __name__ == "__main__":
    batch, n_in, n_out = 8, 32, 16

    root = jax.random.PRNGKey(0)
    k_init, k_x, k_eps_w, k_eps_b = jax.random.split(root, 4)

    x = jax.random.normal(k_x, (batch, n_in), jnp.float32)
    eps_w = jax.random.normal(k_eps_w, (n_out, n_in), jnp.float32)
    eps_b = jax.random.normal(k_eps_b, (n_out,), jnp.float32)

    # Case 1: fully Bayesian layer (default bayes_factor = 1 -> all rows sampled).
    mu_w, rho_w, mu_b, rho_b, is_bw, is_bb = init_linear_bayes_params(
        k_init, n_in, n_out)
    y1 = linear_bayes_forward(x, mu_w, rho_w, eps_w, is_bw,
                              mu_b, rho_b, eps_b, is_bb)
    y1 = jax.block_until_ready(y1)
    y1_ref = _reference(x, mu_w, rho_w, eps_w, is_bw, mu_b, rho_b, eps_b, is_bb)
    assert y1.shape == (batch, n_out)
    assert jnp.allclose(y1, y1_ref, atol=1e-4, rtol=1e-4), \
        float(jnp.max(jnp.abs(y1 - y1_ref)))

    # Case 2: no Bayesian rows (bayes_factor 0) -> exercises the deterministic
    # (transcendental-skipping) branch of the kernel.
    mu_w2, rho_w2, mu_b2, rho_b2, is_bw2, is_bb2 = init_linear_bayes_params(
        k_init, n_in, n_out, bayes_factor_w=0, bayes_factor_b=0)
    y2 = linear_bayes_forward(x, mu_w2, rho_w2, eps_w, is_bw2,
                              mu_b2, rho_b2, eps_b, is_bb2)
    y2 = jax.block_until_ready(y2)
    y2_ref = _reference(x, mu_w2, rho_w2, eps_w, is_bw2, mu_b2, rho_b2, eps_b, is_bb2)
    assert y2.shape == (batch, n_out)
    assert jnp.allclose(y2, y2_ref, atol=1e-4, rtol=1e-4), \
        float(jnp.max(jnp.abs(y2 - y2_ref)))

    print("KERNEL_OK")
</pallas_src>

<mosaic_0001>
module attributes {stable_mosaic.version = 11 : i64} {
  func.func @_linear_bayes_kernel(%arg0: i32, %arg1: i32, %arg2: i32, %arg3: memref<1xi32, #tpu.memory_space<smem>>, %arg4: memref<8x128xf32, #tpu.memory_space<vmem>>, %arg5: memref<128x128xf32, #tpu.memory_space<vmem>>, %arg6: memref<128x128xf32, #tpu.memory_space<vmem>>, %arg7: memref<128x128xf32, #tpu.memory_space<vmem>>, %arg8: memref<8x128xf32, #tpu.memory_space<vmem>>, %arg9: memref<8x128xf32, #tpu.memory_space<vmem>>, %arg10: memref<8x128xf32, #tpu.memory_space<vmem>>, %arg11: memref<128x128xf32, #tpu.memory_space<vmem>>) attributes {dimension_semantics = [#tpu.dimension_semantics<parallel>, #tpu.dimension_semantics<parallel>, #tpu.dimension_semantics<arbitrary>], iteration_bounds = array<i64: 1, 1, 1>, scalar_prefetch = 1 : i64, scratch_operands = 2 : i64, tpu.core_type = #tpu.core_type<tc>, window_params = [{transform_indices = @transform_0, window_bounds = array<i64: 8, 128>}, {transform_indices = @transform_1, window_bounds = array<i64: 128, 128>}, {transform_indices = @transform_2, window_bounds = array<i64: 128, 128>}, {transform_indices = @transform_3, window_bounds = array<i64: 128, 128>}, {transform_indices = @transform_4, window_bounds = array<i64: 8, 128>}, {transform_indices = @transform_5, window_bounds = array<i64: 8, 128>}]} {
    %c0_i32 = arith.constant 0 : i32
    %0 = arith.cmpi eq, %arg2, %c0_i32 : i32
    %1 = arith.extui %0 : i1 to i32
    %c0_i32_0 = arith.constant 0 : i32
    %2 = arith.cmpi ne, %1, %c0_i32_0 : i32
    scf.if %2 {
      %cst_13 = arith.constant 0.000000e+00 : f32
      %20 = vector.broadcast %cst_13 : f32 to vector<8x128xf32>
      %c0_14 = arith.constant 0 : index
      %c0_15 = arith.constant 0 : index
      %21 = vector.load %arg10[%c0_14, %c0_15] : memref<8x128xf32, #tpu.memory_space<vmem>>, vector<8x128xf32>
      tpu.vector_store %arg10[%c0_14, %c0_15], %20 {strides = array<i32>} : memref<8x128xf32, #tpu.memory_space<vmem>>, vector<8x128xf32>,
    } else {
    }
    %3 = arith.index_cast %arg1 : i32 to index
    %4 = memref.load %arg3[%3] : memref<1xi32, #tpu.memory_space<smem>>
    %c0_i32_1 = arith.constant 0 : i32
    %5 = arith.cmpi sgt, %4, %c0_i32_1 : i32
    %6 = arith.extui %5 : i1 to i32
    %c0_i32_2 = arith.constant 0 : i32
    %7 = arith.cmpi ne, %6, %c0_i32_2 : i32
    scf.if %7 {
      %c0_13 = arith.constant 0 : index
      %c0_14 = arith.constant 0 : index
      %20 = vector.load %arg6[%c0_13, %c0_14] : memref<128x128xf32, #tpu.memory_space<vmem>>, vector<128x128xf32>
      %cst_15 = arith.constant 0.000000e+00 : f32
      %21 = vector.broadcast %cst_15 : f32 to vector<128x128xf32>
      %22 = arith.maximumf %20, %21 : vector<128x128xf32>
      %23 = math.absf %20 : vector<128x128xf32>
      %cst_16 = arith.constant 0.000000e+00 : f32
      %24 = vector.broadcast %cst_16 : f32 to vector<128x128xf32>
      %25 = arith.subf %24, %23 : vector<128x128xf32>
      %26 = math.exp %25 : vector<128x128xf32>
      %27 = math.log1p %26 : vector<128x128xf32>
      %28 = arith.addf %22, %27 : vector<128x128xf32>
      %c0_17 = arith.constant 0 : index
      %c0_18 = arith.constant 0 : index
      %29 = vector.load %arg5[%c0_17, %c0_18] : memref<128x128xf32, #tpu.memory_space<vmem>>, vector<128x128xf32>
      %c0_19 = arith.constant 0 : index
      %c0_20 = arith.constant 0 : index
      %30 = vector.load %arg7[%c0_19, %c0_20] : memref<128x128xf32, #tpu.memory_space<vmem>>, vector<128x128xf32>
      %31 = arith.mulf %28, %30 : vector<128x128xf32>
      %32 = arith.addf %29, %31 : vector<128x128xf32>
      %c0_21 = arith.constant 0 : index
      %c0_22 = arith.constant 0 : index
      %33 = vector.load %arg11[%c0_21, %c0_22] : memref<128x128xf32, #tpu.memory_space<vmem>>, vector<128x128xf32>
      tpu.vector_store %arg11[%c0_21, %c0_22], %32 {strides = array<i32>} : memref<128x128xf32, #tpu.memory_space<vmem>>, vector<128x128xf32>,
    } else {
    }
    %true = arith.constant true
    %8 = arith.xori %5, %true : i1
    %9 = arith.extui %8 : i1 to i32
    %c0_i32_3 = arith.constant 0 : i32
    %10 = arith.cmpi ne, %9, %c0_i32_3 : i32
    scf.if %10 {
      %c0_13 = arith.constant 0 : index
      %c0_14 = arith.constant 0 : index
      %20 = vector.load %arg5[%c0_13, %c0_14] : memref<128x128xf32, #tpu.memory_space<vmem>>, vector<128x128xf32>
      %c0_15 = arith.constant 0 : index
      %c0_16 = arith.constant 0 : index
      %21 = vector.load %arg11[%c0_15, %c0_16] : memref<128x128xf32, #tpu.memory_space<vmem>>, vector<128x128xf32>
      tpu.vector_store %arg11[%c0_15, %c0_16], %20 {strides = array<i32>} : memref<128x128xf32, #tpu.memory_space<vmem>>, vector<128x128xf32>,
    } else {
    }
    %c0 = arith.constant 0 : index
    %c0_4 = arith.constant 0 : index
    %11 = vector.load %arg10[%c0, %c0_4] : memref<8x128xf32, #tpu.memory_space<vmem>>, vector<8x128xf32>
    %c0_5 = arith.constant 0 : index
    %c0_6 = arith.constant 0 : index
    %12 = vector.load %arg4[%c0_5, %c0_6] : memref<8x128xf32, #tpu.memory_space<vmem>>, vector<8x128xf32>
    %c0_7 = arith.constant 0 : index
    %c0_8 = arith.constant 0 : index
    %13 = vector.load %arg11[%c0_7, %c0_8] : memref<128x128xf32, #tpu.memory_space<vmem>>, vector<128x128xf32>
    %cst = arith.constant dense<0.000000e+00> : vector<8x128xf32>
    %14 = tpu.matmul %12, %13, %cst {dimension_numbers = #tpu.dot_dimension_numbers<[1], [1], [0], [0], [0, 0, 1, 0], [], []>} : vector<8x128xf32>, vector<128x128xf32>, vector<8x128xf32> -> vector<8x128xf32>
    %15 = arith.addf %11, %14 : vector<8x128xf32>
    %c0_9 = arith.constant 0 : index
    %c0_10 = arith.constant 0 : index
    %16 = vector.load %arg10[%c0_9, %c0_10] : memref<8x128xf32, #tpu.memory_space<vmem>>, vector<8x128xf32>
    tpu.vector_store %arg10[%c0_9, %c0_10], %15 {strides = array<i32>} : memref<8x128xf32, #tpu.memory_space<vmem>>, vector<8x128xf32>,
    %c0_i32_11 = arith.constant 0 : i32
    %17 = arith.cmpi eq, %arg2, %c0_i32_11 : i32
    %18 = arith.extui %17 : i1 to i32
    %c0_i32_12 = arith.constant 0 : i32
    %19 = arith.cmpi ne, %18, %c0_i32_12 : i32
    scf.if %19 {
      %c0_13 = arith.constant 0 : index
      %c0_14 = arith.constant 0 : index
      %20 = vector.load %arg8[%c0_13, %c0_14] : memref<8x128xf32, #tpu.memory_space<vmem>>, vector<1x128xf32>
      %c1 = arith.constant 1 : index
      %c0_15 = arith.constant 0 : index
      %21 = vector.load %arg8[%c1, %c0_15] : memref<8x128xf32, #tpu.memory_space<vmem>>, vector<1x128xf32>
      %c2 = arith.constant 2 : index
      %c0_16 = arith.constant 0 : index
      %22 = vector.load %arg8[%c2, %c0_16] : memref<8x128xf32, #tpu.memory_space<vmem>>, vector<1x128xf32>
      %cst_17 = arith.constant 0.000000e+00 : f32
      %23 = vector.broadcast %cst_17 : f32 to vector<1x128xf32>
      %24 = arith.maximumf %21, %23 : vector<1x128xf32>
      %25 = math.absf %21 : vector<1x128xf32>
      %cst_18 = arith.constant 0.000000e+00 : f32
      %26 = vector.broadcast %cst_18 : f32 to vector<1x128xf32>
      %27 = arith.subf %26, %25 : vector<1x128xf32>
      %28 = math.exp %27 : vector<1x128xf32>
      %29 = math.log1p %28 : vector<1x128xf32>
      %30 = arith.addf %24, %29 : vector<1x128xf32>
      %31 = arith.mulf %30, %22 : vector<1x128xf32>
      %32 = arith.addf %20, %31 : vector<1x128xf32>
      %c0_19 = arith.constant 0 : index
      %c0_20 = arith.constant 0 : index
      %33 = vector.load %arg10[%c0_19, %c0_20] : memref<8x128xf32, #tpu.memory_space<vmem>>, vector<8x128xf32>
      %34 = vector.broadcast %32 : vector<1x128xf32> to vector<8x128xf32>
      %35 = arith.addf %33, %34 : vector<8x128xf32>
      %c0_21 = arith.constant 0 : index
      %c0_22 = arith.constant 0 : index
      %36 = vector.load %arg9[%c0_21, %c0_22] : memref<8x128xf32, #tpu.memory_space<vmem>>, vector<8x128xf32>
      tpu.vector_store %arg9[%c0_21, %c0_22], %35 {strides = array<i32>} : memref<8x128xf32, #tpu.memory_space<vmem>>, vector<8x128xf32>,
    } else {
    }
    return
  }
  func.func @transform_0(%arg0: i32, %arg1: i32, %arg2: i32, %arg3: memref<1xi32, #tpu.memory_space<smem>>) -> (i32, i32) {
    %c0_i32 = arith.constant 0 : i32
    return %arg0, %arg2 : i32, i32
  }
  func.func @transform_1(%arg0: i32, %arg1: i32, %arg2: i32, %arg3: memref<1xi32, #tpu.memory_space<smem>>) -> (i32, i32) {
    %c0_i32 = arith.constant 0 : i32
    return %arg1, %arg2 : i32, i32
  }
  func.func @transform_2(%arg0: i32, %arg1: i32, %arg2: i32, %arg3: memref<1xi32, #tpu.memory_space<smem>>) -> (i32, i32) {
    %c0_i32 = arith.constant 0 : i32
    return %arg1, %arg2 : i32, i32
  }
  func.func @transform_3(%arg0: i32, %arg1: i32, %arg2: i32, %arg3: memref<1xi32, #tpu.memory_space<smem>>) -> (i32, i32) {
    %c0_i32 = arith.constant 0 : i32
    return %arg1, %arg2 : i32, i32
  }
  func.func @transform_4(%arg0: i32, %arg1: i32, %arg2: i32, %arg3: memref<1xi32, #tpu.memory_space<smem>>) -> (i32, i32) {
    %c0_i32 = arith.constant 0 : i32
    %c0_i32_0 = arith.constant 0 : i32
    return %c0_i32, %arg1 : i32, i32
  }
  func.func @transform_5(%arg0: i32, %arg1: i32, %arg2: i32, %arg3: memref<1xi32, #tpu.memory_space<smem>>) -> (i32, i32) {
    %c0_i32 = arith.constant 0 : i32
    return %arg0, %arg1 : i32, i32
  }
}

</mosaic_0001>

<bundles_post_ra>
// kernel: tpu_custom_call.1
= control target key start
LH: loop header
LB: loop body
LE: loop exit
PB: predicated region body
PF: predicated region fallthrough
CT: control target
= control target key end

     0   :  { %12 = vsyncpa [#allocation7], 0  ;;  %s1126_s0 = inlined_call_operand.<no memory space> [shape: s32[1], index: 0, kind: input, shape index: {}]   ;;  %s1127_s1 = inlined_call_operand.hbm [shape: f32[8,128], index: 1, kind: input, shape index: {}]   ;;  %s1128_s2 = inlined_call_operand.hbm [shape: f32[128,128], index: 2, kind: input, shape index: {}]   ;;  %s1129_s3 = inlined_call_operand.hbm [shape: f32[128,128], index: 3, kind: input, shape index: {}]   ;;  %s1130_s4 = inlined_call_operand.hbm [shape: f32[128,128], index: 4, kind: input, shape index: {}]   ;;  %s1131_s5 = inlined_call_operand.vmem [shape: f32[8,128], index: 5, kind: input, shape index: {}]   ;;  %s1132_s6 = inlined_call_operand.hbm [shape: f32[8,128], index: 6, kind: output, shape index: {}]  }
   0x1   :  { %13 = vsyncpa [#allocation10], 0 }
   0x2   :  { %14 = vsyncpa [#allocation13], 0 }
   0x3   :  { %15 = vsyncpa [#allocation8], 0  ;;  %s834_s21 = smov [#allocation9]  }
   0x4   :  { %s31_s22 = sshll.u32 %s834_s21, 4  ;;  %s32_s22 = int_to_ptr.vmem [resolvable:$true] %s31_s22 }
   0x5   :  { %s734_s23 = scalar_lea.vmem %s32_s22, 2048  ;;  %p739_p1 = scmp.lt.s32.totalorder %s32_s22, %s32_s22 }
   0x6   :  { %p735_p0 = scmp.ne.s32.totalorder %s32_s22, %s734_s23  ;;  %p740_p2 = scmp.lt.s32.totalorder %s734_s23, %s734_s23 }
   0x8   :  { %p741_p3 = por %p740_p2, %p739_p1 }
   0xa   :  { %p742_p4 = pnand %p741_p3, %p735_p0 }
   0xc   :  { %745 = shalt.err (!%p742_p4)
}
   0xd   :  { %s835_s24 = smov 128   ;;  %s836_s25 = smov 8  }
   0xe   :  { %37 = dma.hbm_to_vmem [thread:$0]  %s1128_s2, 2048, %s32_s22, [#allocation10], %s835_s24, %s835_s24, %s836_s25  }
   0xf   :  { %s837_s28 = smov [#allocation6]   ;;  %s838_s30 = smov [#allocation11]  }
  0x10   :  { %s22_s29 = sshll.u32 %s837_s28, 4  ;;  %s43_s7 = sshll.u32 %s838_s30, 4  ;;  %s23_s29 = int_to_ptr.vmem [resolvable:$true] %s22_s29  ;;  %s44_s7 = int_to_ptr.vmem [resolvable:$true] %s43_s7 }
  0x11   :  { %s754_s8 = scalar_lea.vmem %s23_s29, 128  ;;  %p759_p6 = scmp.lt.s32.totalorder %s23_s29, %s23_s29 }
  0x12   :  { %p755_p5 = scmp.ne.s32.totalorder %s23_s29, %s754_s8  ;;  %p760_p7 = scmp.lt.s32.totalorder %s754_s8, %s754_s8 }
  0x14   :  { %p761_p8 = por %p760_p7, %p759_p6 }
  0x16   :  { %p762_p9 = pnand %p761_p8, %p755_p5 }
  0x18   :  { %765 = shalt.err (!%p762_p9)
}
  0x19   :  { %25 = dma.hbm_to_vmem [thread:$0]  %s1127_s1, 128, %s23_s29, [#allocation7]  }
  0x1a   :  { %s774_s11 = scalar_lea.vmem %s44_s7, 2048  ;;  %p779_p11 = scmp.lt.s32.totalorder %s44_s7, %s44_s7 }
  0x1b   :  { %p775_p10 = scmp.ne.s32.totalorder %s44_s7, %s774_s11  ;;  %p780_p12 = scmp.lt.s32.totalorder %s774_s11, %s774_s11 }
  0x1d   :  { %p781_p13 = por %p780_p12, %p779_p11 }
  0x1f   :  { %p782_p0 = pnand %p781_p13, %p775_p10 }
  0x21   :  { %785 = shalt.err (!%p782_p0)
}
  0x22   :  { %49 = dma.hbm_to_vmem [thread:$0]  %s1129_s3, 2048, %s44_s7, [#allocation10], %s835_s24, %s835_s24, %s836_s25  }
  0x23   :  { %s839_s13 = smov [#allocation12]  }
  0x24   :  { %s55_s14 = sshll.u32 %s839_s13, 4  ;;  %s56_s14 = int_to_ptr.vmem [resolvable:$true] %s55_s14 }
  0x25   :  { %s794_s15 = scalar_lea.vmem %s56_s14, 2048  ;;  %p799_p2 = scmp.lt.s32.totalorder %s56_s14, %s56_s14 }
  0x26   :  { %p795_p1 = scmp.ne.s32.totalorder %s56_s14, %s794_s15  ;;  %p800_p3 = scmp.lt.s32.totalorder %s794_s15, %s794_s15 }
  0x28   :  { %p801_p4 = por %p800_p3, %p799_p2 }
  0x2a   :  { %p802_p5 = pnand %p801_p4, %p795_p1 }
  0x2c   :  { %805 = shalt.err (!%p802_p5)
}
  0x2d   :  { %61 = dma.hbm_to_vmem [thread:$0]  %s1130_s4, 2048, %s56_s14, [#allocation13], %s835_s24, %s835_s24, %s836_s25  }
  0x2e   :  { %826 = dma.done.wait [#allocation7], 128  }
  0x2f   :  { %827 = vsyncadd [#allocation7], 4294967168 }
  0x30   :  { %828 = dma.done.wait [#allocation10], 4096  }
  0x31   :  { %829 = vsyncadd [#allocation10], 4294963200 }
  0x32   :  { %830 = dma.done.wait [#allocation13], 2048  }
  0x33   :  { %831 = vsyncadd [#allocation13], 4294965248  ;;  %v1133_v0 = vmov 0.0   ;;  %p595_p6 = scmp.le.s32.totalorder %s1126_s0, 0 }
  0x34   :  { %80 = vst [vmem:[#allocation2] sm:$0xff] %v1133_v0 }
  0x35   :  { %85 = sbr.rel (%p595_p6) target bundleno = 158 (0x9e), region = 45 }
  0x3a   :  { %v903_v1 = vld [vmem:[#allocation11] sm:$0xff]  ;;  %v906_v3 = vld [vmem:[#allocation11 + $0x8] sm:$0xff]  ;;  %v909_v5 = vld [vmem:[#allocation11 + $0x10] sm:$0xff] }
  0x3b   :  { %v118_v2 = vand.u32 2147483647, %v903_v1  ;;  %v119_v4 = vand.u32 2147483647, %v906_v3  ;;  %v120_v7 = vand.u32 2147483647, %v909_v5 }
  0x3c   :  { %v912_v8 = vld [vmem:[#allocation11 + $0x18] sm:$0xff]  ;;  %v915_v11 = vld [vmem:[#allocation11 + $0x20] sm:$0xff]  ;;  %v918_v17 = vld [vmem:[#allocation11 + $0x28] sm:$0xff]  ;;  %v102_v43 = vmax.f32 %v903_v1, 0.0  ;;  %v103_v45 = vmax.f32 %v906_v3, 0.0  ;;  %v104_v46 = vmax.f32 %v909_v5, 0.0 }
  0x3d   :  { %v134_v6 = vsub.f32 0.0, %v118_v2  ;;  %v135_v9 = vsub.f32 0.0, %v119_v4  ;;  %v121_v10 = vand.u32 2147483647, %v912_v8  ;;  %v136_v13 = vsub.f32 0.0, %v120_v7  ;;  %v921_v22 = vld [vmem:[#allocation11 + $0x30] sm:$0xff] }
  0x3e   :  { %v122_v14 = vand.u32 2147483647, %v915_v11  ;;  %v123_v21 = vand.u32 2147483647, %v918_v17  ;;  %v124_v24 = vand.u32 2147483647, %v921_v22 }
  0x3f   :  { %v150_v12 = vmul.f32 1.442695, %v134_v6  ;;  %v152_v15 = vmul.f32 1.442695, %v135_v9  ;;  %v137_v16 = vsub.f32 0.0, %v121_v10  ;;  %v924_v26 = vld [vmem:[#allocation11 + $0x38] sm:$0xff] }
  0x40   :  { %v154_v18 = vmul.f32 1.442695, %v136_v13  ;;  %v138_v19 = vsub.f32 0.0, %v122_v14  ;;  %v139_v25 = vsub.f32 0.0, %v123_v21  ;;  %v140_v27 = vsub.f32 0.0, %v124_v24  ;;  %v927_v29 = vld [vmem:[#allocation11 + $0x40] sm:$0xff] }
  0x41   :  { %658 = vpow2.f32 %v150_v12  ;;  %v156_v20 = vmul.f32 1.442695, %v137_v16  ;;  %v125_v28 = vand.u32 2147483647, %v924_v26  ;;  %v126_v31 = vand.u32 2147483647, %v927_v29 }
  0x42   :  { %660 = vpow2.f32 %v152_v15  ;;  %v158_v23 = vmul.f32 1.442695, %v138_v19  ;;  %v160_v30 = vmul.f32 1.442695, %v139_v25  ;;  %v162_v32 = vmul.f32 1.442695, %v140_v27 }
  0x43   :  { %662 = vpow2.f32 %v154_v18  ;;  %v141_v33 = vsub.f32 0.0, %v125_v28  ;;  %v930_v34 = vld [vmem:[#allocation11 + $0x48] sm:$0xff]  ;;  %v142_v35 = vsub.f32 0.0, %v126_v31  ;;  %v933_v37 = vld [vmem:[#allocation11 + $0x50] sm:$0xff]  ;;  %v936_v42 = vld [vmem:[#allocation11 + $0x58] sm:$0xff]  ;;  %v105_v48 = vmax.f32 %v912_v8, 0.0 }
  0x44   :  { %664 = vpow2.f32 %v156_v20  ;;  %v127_v36 = vand.u32 2147483647, %v930_v34  ;;  %v128_v39 = vand.u32 2147483647, %v933_v37  ;;  %v129_v50 = vand.u32 2147483647, %v936_v42 }
  0x45   :  { %666 = vpow2.f32 %v158_v23  ;;  %v164_v38 = vmul.f32 1.442695, %v141_v33  ;;  %v166_v40 = vmul.f32 1.442695, %v142_v35  ;;  %v943_v51 = vld [vmem:[#allocation11 + $0x60] sm:$0xff]  ;;  %v106_v53 = vmax.f32 %v915_v11, 0.0 }
  0x46   :  { %668 = vpow2.f32 %v160_v30  ;;  %v143_v41 = vsub.f32 0.0, %v127_v36  ;;  %v144_v44 = vsub.f32 0.0, %v128_v39  ;;  %v107_v54 = vmax.f32 %v918_v17, 0.0  ;;  %v951_v10 = vld [vmem:[#allocation11 + $0x68] sm:$0xff] }
  0x47   :  { %670 = vpow2.f32 %v162_v32  ;;  %v108_v55 = vmax.f32 %v921_v22, 0.0  ;;  %v109_v59 = vmax.f32 %v924_v26, 0.0  ;;  %v110_v60 = vmax.f32 %v927_v29, 0.0  ;;  %v365_v22 = vld [vmem:[#allocation12 + $0x38] sm:$0xff] }
  0x48   :  { %672 = vpow2.f32 %v164_v38  ;;  %v168_v47 = vmul.f32 1.442695, %v143_v41  ;;  %v170_v49 = vmul.f32 1.442695, %v144_v44  ;;  %v130_v2 = vand.u32 2147483647, %v943_v51 }
  0x49   :  { %674 = vpow2.f32 %v166_v40  ;;  %v145_v9 = vsub.f32 0.0, %v129_v50  ;;  %v111_v19 = vmax.f32 %v930_v34, 0.0  ;;  %v131_v24 = vand.u32 2147483647, %v951_v10  ;;  %v352_v34 = vld [vmem:[#allocation9 + $0x50] sm:$0xff] }
  0x4a   :  { %676 = vpow2.f32 %v168_v47  ;;  %v954_v23 = vsub.f32 0.0, %v130_v2  ;;  %v361_v47 = vld [vmem:[#allocation12 + $0x18] sm:$0xff] }
  0x4b   :  { %678 = vpow2.f32 %v170_v49  ;;  %v957_v30 = vmul.f32 1.442695, %v145_v9 }
  0x4e   :  { %v659_v52 = vpop.eup %658 }
  0x4f   :  { %v661_v56 = vpop.eup %660  ;;  %v182_v57 = vadd.f32 1.0, %v659_v52  ;;  %v185_v58 = vmul.f32 -0.5, %v659_v52  ;;  %v188_v6 = vand.u32 2147483647, %v659_v52 }
  0x50   :  { %v663_v61 = vpop.eup %662  ;;  %v191_v62 = vadd.f32 1.0, %v661_v56  ;;  %v194_v63 = vmul.f32 -0.5, %v661_v56  ;;  %v197_v16 = vand.u32 2147483647, %v661_v56 }
  0x51   :  { %v665_v4 = vpop.eup %664  ;;  %680 = vlog2.f32 %v182_v57  ;;  %v200_v7 = vadd.f32 1.0, %v663_v61  ;;  %v186_v13 = vadd.f32 1.0, %v185_v58  ;;  %v203_v15 = vmul.f32 -0.5, %v663_v61 }
  0x52   :  { %v667_v12 = vpop.eup %666  ;;  %682 = vlog2.f32 %v191_v62  ;;  %v195_v14 = vadd.f32 1.0, %v194_v63  ;;  %v209_v18 = vadd.f32 1.0, %v665_v4  ;;  %v206_v20 = vand.u32 2147483647, %v663_v61 }
  0x53   :  { %684 = vlog2.f32 %v200_v7  ;;  %v212_v21 = vmul.f32 -0.5, %v665_v4  ;;  %v669_v25 = vpop.eup %668  ;;  %v218_v27 = vadd.f32 1.0, %v667_v12  ;;  %v221_v28 = vmul.f32 -0.5, %v667_v12 }
  0x54   :  { %686 = vlog2.f32 %v209_v18  ;;  %v671_v31 = vpop.eup %670  ;;  %v187_v32 = vmul.f32 %v659_v52, %v186_v13  ;;  %vm959_vm0 = vcmp.lt.f32.partialorder %v188_v6, 0.0004427343  ;;  %v963_v35 = vmul.f32 %v661_v56, %v195_v14 }
  0x55   :  { %v204_v36 = vadd.f32 1.0, %v203_v15  ;;  %vm965_vm1 = vcmp.lt.f32.partialorder %v197_v16, 0.0004427343  ;;  %v215_v39 = vand.u32 2147483647, %v665_v4  ;;  %688 = vlog2.f32 %v218_v27  ;;  %v673_v44 = vpop.eup %672 }
  0x56   :  { %v227_v40 = vadd.f32 1.0, %v669_v25  ;;  %v230_v41 = vmul.f32 -0.5, %v669_v25  ;;  %vm969_vm2 = vcmp.lt.f32.partialorder %v206_v20, 0.0004427343  ;;  %v213_v49 = vadd.f32 1.0, %v212_v21  ;;  %v675_v57 = vpop.eup %674 }
  0x57   :  { %v224_v50 = vand.u32 2147483647, %v667_v12  ;;  %v236_v52 = vadd.f32 1.0, %v671_v31  ;;  %v222_v56 = vadd.f32 1.0, %v221_v28  ;;  %v239_v62 = vmul.f32 -0.5, %v671_v31  ;;  %v973_v7 = vpop.eup %676 }
  0x58   :  { %690 = vlog2.f32 %v227_v40  ;;  %v231_v58 = vadd.f32 1.0, %v230_v41  ;;  %v205_v63 = vmul.f32 %v663_v61, %v204_v36  ;;  %v233_v2 = vand.u32 2147483647, %v669_v25  ;;  %v979_v21 = vpop.eup %678 }
  0x59   :  { %692 = vlog2.f32 %v236_v52  ;;  %v245_v6 = vadd.f32 1.0, %v673_v44  ;;  %vm975_vm3 = vcmp.lt.f32.partialorder %v215_v39, 0.0004427343  ;;  %v240_v13 = vadd.f32 1.0, %v239_v62 }
  0x5a   :  { %v242_v14 = vand.u32 2147483647, %v671_v31  ;;  %v248_v15 = vmul.f32 -0.5, %v673_v44  ;;  %v214_v16 = vmul.f32 %v665_v4, %v213_v49  ;;  %v254_v18 = vadd.f32 1.0, %v675_v57 }
  0x5b   :  { %694 = vlog2.f32 %v245_v6  ;;  %v257_v20 = vmul.f32 -0.5, %v675_v57  ;;  %v981_v27 = vmul.f32 %v667_v12, %v222_v56  ;;  %vm983_vm4 = vcmp.lt.f32.partialorder %v224_v50, 0.0004427343 }
  0x5c   :  { %v987_v28 = vmul.f32 %v669_v25, %v231_v58  ;;  %v249_v36 = vadd.f32 1.0, %v248_v15  ;;  %vm989_vm5 = vcmp.lt.f32.partialorder %v233_v2, 0.0004427343  ;;  %v251_v4 = vand.u32 2147483647, %v673_v44 }
  0x5d   :  { %696 = vlog2.f32 %v254_v18  ;;  %v263_v41 = vadd.f32 1.0, %v973_v7  ;;  %v266_v49 = vmul.f32 -0.5, %v973_v7  ;;  %v995_v50 = vmul.f32 %v671_v31, %v240_v13  ;;  %v358_v18 = vld [vmem:[#allocation12] sm:$0xff] }
  0x5e   :  { %v681_v39 = vpop.eup %680  ;;  %vm997_vm6 = vcmp.lt.f32.partialorder %v242_v14, 0.0004427343  ;;  %v260_v25 = vand.u32 2147483647, %v675_v57  ;;  %v1001_v2 = vmul.f32 %v673_v44, %v249_v36  ;;  %v258_v6 = vadd.f32 1.0, %v257_v20  ;;  %v359_v36 = vld [vmem:[#allocation12 + $0x8] sm:$0xff] }
  0x5f   :  { %v683_v12 = vpop.eup %682  ;;  %v184_v52 = vmul.f32 0.6931472, %v681_v39  ;;  %698 = vlog2.f32 %v263_v41  ;;  %v269_v39 = vand.u32 2147483647, %v973_v7  ;;  %v272_v31 = vadd.f32 1.0, %v979_v21  ;;  %v342_v41 = vld [vmem:[#allocation9] sm:$0xff] }
  0x60   :  { %v685_v58 = vpop.eup %684  ;;  %v193_v62 = vmul.f32 0.6931472, %v683_v12  ;;  %vm1012_vm7 = vcmp.lt.f32.partialorder %v251_v4, 0.0004427343  ;;  %v275_v33 = vmul.f32 -0.5, %v979_v21 }
  0x61   :  { %v190_v15 = vsel %vm959_vm0, %v187_v32, %v184_v52  ;;  %v202_v0 = vmul.f32 0.6931472, %v685_v58  ;;  %v687_v13 = vpop.eup %686  ;;  %v267_v32 = vadd.f32 1.0, %v266_v49  ;;  %700 = vlog2.f32 %v272_v31  ;;  %v343_v58 = vld [vmem:[#allocation9 + $0x8] sm:$0xff]  ;;  %v362_v31 = vld [vmem:[#allocation12 + $0x20] sm:$0xff] }
  0x62   :  { %v326_v14 = vadd.f32 %v190_v15, %v102_v43  ;;  %v199_v44 = vsel %vm965_vm1, %v963_v35, %v193_v62  ;;  %v360_v43 = vld [vmem:[#allocation12 + $0x10] sm:$0xff]  ;;  %v211_v52 = vmul.f32 0.6931472, %v687_v13  ;;  %v689_v38 = vpop.eup %688  ;;  %v1023_v62 = vmul.f32 %v675_v57, %v258_v6 }
  0x63   :  { %v327_v12 = vadd.f32 %v199_v44, %v103_v45  ;;  %v208_v1 = vsel %vm969_vm2, %v205_v63, %v202_v0  ;;  %vm1025_vm8 = vcmp.lt.f32.partialorder %v260_v25, 0.0004427343  ;;  %v344_v45 = vld [vmem:[#allocation9 + $0x10] sm:$0xff]  ;;  %v220_v63 = vmul.f32 0.6931472, %v689_v38 }
  0x64   :  { %v374_v35 = vmul.f32 %v358_v18, %v326_v14  ;;  %v328_v4 = vadd.f32 %v208_v1, %v104_v46  ;;  %v217_v0 = vsel %vm975_vm3, %v214_v16, %v211_v52  ;;  %vm1031_vm9 = vcmp.lt.f32.partialorder %v269_v39, 0.0004427343  ;;  %v345_v16 = vld [vmem:[#allocation9 + $0x18] sm:$0xff]  ;;  %v347_v52 = vld [vmem:[#allocation9 + $0x28] sm:$0xff] }
  0x65   :  { %v375_v3 = vmul.f32 %v359_v36, %v327_v12  ;;  %702 = vpow2.f32 %v957_v30  ;;  %v691_v5 = vpop.eup %690  ;;  %v329_v25 = vadd.f32 %v217_v0, %v105_v48  ;;  %v1039_v6 = vmul.f32 %v973_v7, %v267_v32  ;;  %v346_v48 = vld [vmem:[#allocation9 + $0x20] sm:$0xff]  ;;  %v363_v36 = vld [vmem:[#allocation12 + $0x28] sm:$0xff]  ;;  %v1053_v12 = vld [vmem:[#allocation11 + $0x70] sm:$0xff] }
  0x66   :  { %v390_v46 = vadd.f32 %v374_v35, %v342_v41  ;;  %v376_v57 = vmul.f32 %v360_v43, %v328_v4  ;;  %v693_v18 = vpop.eup %692  ;;  %v226_v39 = vsel %vm983_vm4, %v981_v27, %v220_v63  ;;  %v229_v13 = vmul.f32 0.6931472, %v691_v5  ;;  %v348_v4 = vld [vmem:[#allocation9 + $0x30] sm:$0xff]  ;;  %v366_v5 = vld [vmem:[#allocation12 + $0x40] sm:$0xff] }
  0x67   :  { %v391_v9 = vadd.f32 %v375_v3, %v343_v58  ;;  %v276_v14 = vadd.f32 1.0, %v275_v33  ;;  %v377_v44 = vmul.f32 %v361_v47, %v329_v25  ;;  %v330_v8 = vadd.f32 %v226_v39, %v106_v53  ;;  %v349_v25 = vld [vmem:[#allocation9 + $0x38] sm:$0xff] }
  0x68   :  { %406 = vst [vmem:[#allocation3 + $0x30] sm:$0xff] %v390_v46  ;;  %v392_v30 = vadd.f32 %v376_v57, %v344_v45  ;;  %v238_v7 = vmul.f32 0.6931472, %v693_v18  ;;  %v695_v32 = vpop.eup %694  ;;  %v235_v41 = vsel %vm989_vm5, %v987_v28, %v229_v13  ;;  %v278_v27 = vand.u32 2147483647, %v979_v21  ;;  %v364_v28 = vld [vmem:[#allocation12 + $0x30] sm:$0xff] }
  0x69   :  { %407 = vst [vmem:[#allocation3] sm:$0xff] %v391_v9  ;;  %v174_v61 = vmul.f32 1.442695, %v954_v23  ;;  %v147_v33 = vsub.f32 0.0, %v131_v24  ;;  %v393_v11 = vadd.f32 %v377_v44, %v345_v16  ;;  %v378_v53 = vmul.f32 %v362_v31, %v330_v8  ;;  %v350_v16 = vld [vmem:[#allocation9 + $0x40] sm:$0xff]  ;;  %v368_v8 = vld [vmem:[#allocation12 + $0x50] sm:$0xff] }
  0x6a   :  { %408 = vst [vmem:[#allocation3 + $0x58] sm:$0xff] %v392_v30  ;;  %v331_v1 = vadd.f32 %v235_v41, %v107_v54  ;;  %v244_v40 = vsel %vm997_vm6, %v995_v50, %v238_v7  ;;  %v697_v43 = vpop.eup %696  ;;  %v247_v38 = vmul.f32 0.6931472, %v695_v32  ;;  %v132_v17 = vand.u32 2147483647, %v1053_v12  ;;  %v1063_v54 = vld [vmem:[#allocation11 + $0x78] sm:$0xff] }
  0x6b   :  { %v332_v23 = vadd.f32 %v244_v40, %v108_v55  ;;  %704 = vpow2.f32 %v174_v61  ;;  %v176_v24 = vmul.f32 1.442695, %v147_v33  ;;  %409 = vst [vmem:[#allocation3 + $0x18] sm:$0xff] %v393_v11  ;;  %v394_v35 = vadd.f32 %v378_v53, %v346_v48  ;;  %v351_v30 = vld [vmem:[#allocation9 + $0x48] sm:$0xff] }
  0x6c   :  { %v379_v58 = vmul.f32 %v363_v36, %v331_v1  ;;  %v256_v3 = vmul.f32 0.6931472, %v697_v43  ;;  %v699_v56 = vpop.eup %698  ;;  %v253_v45 = vsel %vm1012_vm7, %v1001_v2, %v247_v38  ;;  %v277_v55 = vmul.f32 %v979_v21, %v276_v14 }
  0x6d   :  { %v380_v50 = vmul.f32 %v364_v28, %v332_v23  ;;  %706 = vpow2.f32 %v176_v24  ;;  %410 = vst [vmem:[#allocation3 + $0x50] sm:$0xff] %v394_v35  ;;  %v333_v47 = vadd.f32 %v253_v45, %v109_v59  ;;  %v265_v46 = vmul.f32 0.6931472, %v699_v56  ;;  %v367_v59 = vld [vmem:[#allocation12 + $0x48] sm:$0xff] }
  0x6e   :  { %v395_v0 = vadd.f32 %v379_v58, %v347_v52  ;;  %v262_v63 = vsel %vm1025_vm8, %v1023_v62, %v256_v3  ;;  %v148_v20 = vsub.f32 0.0, %v132_v17  ;;  %v133_v21 = vand.u32 2147483647, %v1063_v54  ;;  %v701_v18 = vpop.eup %700 }
  0x6f   :  { %v396_v57 = vadd.f32 %v380_v50, %v348_v4  ;;  %v334_v2 = vadd.f32 %v262_v63, %v110_v60  ;;  %v381_v9 = vmul.f32 %v365_v22, %v333_v47  ;;  %v271_v26 = vsel %vm1031_vm9, %v1039_v6, %v265_v46  ;;  %v369_v50 = vld [vmem:[#allocation12 + $0x58] sm:$0xff] }
  0x70   :  { %411 = vst [vmem:[#allocation3 + $0x68] sm:$0xff] %v395_v0  ;;  %v112_v62 = vmax.f32 %v933_v37, 0.0  ;;  %vm1081_vm10 = vcmp.lt.f32.partialorder %v278_v27, 0.0004427343  ;;  %v335_v60 = vadd.f32 %v271_v26, %v111_v19  ;;  %v274_v39 = vmul.f32 0.6931472, %v701_v18 }
  0x71   :  { %412 = vst [vmem:[#allocation3 + $0x8] sm:$0xff] %v396_v57  ;;  %v382_v29 = vmul.f32 %v366_v5, %v334_v2  ;;  %v178_v31 = vmul.f32 1.442695, %v148_v20  ;;  %v397_v14 = vadd.f32 %v381_v9, %v349_v25  ;;  %v149_v44 = vsub.f32 0.0, %v133_v21  ;;  %v353_v47 = vld [vmem:[#allocation9 + $0x58] sm:$0xff] }
  0x72   :  { %v703_v13 = vpop.eup %702  ;;  %v383_v6 = vmul.f32 %v367_v59, %v335_v60  ;;  %v280_v37 = vsel %vm1081_vm10, %v277_v55, %v274_v39  ;;  %v113_v24 = vmax.f32 %v936_v42, 0.0  ;;  %v114_v42 = vmax.f32 %v943_v51, 0.0  ;;  %v371_v39 = vld [vmem:[#allocation12 + $0x68] sm:$0xff] }
  0x73   :  { %v398_v15 = vadd.f32 %v382_v29, %v350_v16  ;;  %v281_v48 = vadd.f32 1.0, %v703_v13  ;;  %413 = vst [vmem:[#allocation3 + $0x48] sm:$0xff] %v397_v14  ;;  %v336_v36 = vadd.f32 %v280_v37, %v112_v62  ;;  %708 = vpow2.f32 %v178_v31  ;;  %v370_v16 = vld [vmem:[#allocation12 + $0x60] sm:$0xff]  ;;  %v355_v14 = vld [vmem:[#allocation9 + $0x68] sm:$0xff] }
  0x74   :  { %v399_v7 = vadd.f32 %v383_v6, %v351_v30  ;;  %v180_v19 = vmul.f32 1.442695, %v149_v44  ;;  %v284_v61 = vmul.f32 -0.5, %v703_v13  ;;  %v287_v40 = vand.u32 2147483647, %v703_v13  ;;  %v354_v29 = vld [vmem:[#allocation9 + $0x60] sm:$0xff] }
  0x75   :  { %414 = vst [vmem:[#allocation3 + $0x40] sm:$0xff] %v398_v15  ;;  %710 = vlog2.f32 %v281_v48  ;;  %v384_v32 = vmul.f32 %v368_v8, %v336_v36  ;;  %v115_v18 = vmax.f32 %v951_v10, 0.0  ;;  %v116_v8 = vmax.f32 %v1053_v12, 0.0 }
  0x76   :  { %415 = vst [vmem:[#allocation3 + $0x20] sm:$0xff] %v399_v7  ;;  %712 = vpow2.f32 %v180_v19  ;;  %v285_v1 = vadd.f32 1.0, %v284_v61  ;;  %vm288_vm11 = vcmp.lt.f32.partialorder %v287_v40, 0.0004427343 }
  0x77   :  { %v400_v27 = vadd.f32 %v384_v32, %v352_v34  ;;  %v372_v32 = vld [vmem:[#allocation12 + $0x70] sm:$0xff] }
  0x78   :  { %v705_v41 = vpop.eup %704  ;;  %v286_v52 = vmul.f32 %v703_v13, %v285_v1  ;;  %v373_v1 = vld [vmem:[#allocation12 + $0x78] sm:$0xff] }
  0x79   :  { %v290_v33 = vadd.f32 1.0, %v705_v41  ;;  %416 = vst [vmem:[#allocation3 + $0x10] sm:$0xff] %v400_v27  ;;  %v293_v28 = vmul.f32 -0.5, %v705_v41  ;;  %v296_v17 = vand.u32 2147483647, %v705_v41 }
  0x7a   :  { %v707_v11 = vpop.eup %706 }
  0x7b   :  { %714 = vlog2.f32 %v290_v33  ;;  %v299_v53 = vadd.f32 1.0, %v707_v11  ;;  %v302_v23 = vmul.f32 -0.5, %v707_v11  ;;  %v294_v4 = vadd.f32 1.0, %v293_v28  ;;  %v356_v33 = vld [vmem:[#allocation9 + $0x70] sm:$0xff]  ;;  %v357_v28 = vld [vmem:[#allocation9 + $0x78] sm:$0xff] }
  0x7c   :  { %v305_v0 = vand.u32 2147483647, %v707_v11  ;;  %vm297_vm12 = vcmp.lt.f32.partialorder %v296_v17, 0.0004427343 }
  0x7d   :  { %716 = vlog2.f32 %v299_v53  ;;  %v303_v45 = vadd.f32 1.0, %v302_v23  ;;  %v295_v63 = vmul.f32 %v705_v41, %v294_v4  ;;  %v117_v41 = vmax.f32 %v1063_v54, 0.0 }
  0x7e   :  { %vm306_vm13 = vcmp.lt.f32.partialorder %v305_v0, 0.0004427343 }
  0x7f   :  { %v304_v2 = vmul.f32 %v707_v11, %v303_v45 }
  0x80   :  { %v709_v43 = vpop.eup %708 }
  0x81   :  { %v308_v35 = vadd.f32 1.0, %v709_v43  ;;  %v311_v57 = vmul.f32 -0.5, %v709_v43  ;;  %v314_v51 = vand.u32 2147483647, %v709_v43 }
  0x82   :  { %v711_v38 = vpop.eup %710 }
  0x83   :  { %v283_v58 = vmul.f32 0.6931472, %v711_v38  ;;  %v713_v3 = vpop.eup %712  ;;  %718 = vlog2.f32 %v308_v35  ;;  %v312_v49 = vadd.f32 1.0, %v311_v57  ;;  %vm315_vm14 = vcmp.lt.f32.partialorder %v314_v51, 0.0004427343 }
  0x84   :  { %v317_v22 = vadd.f32 1.0, %v713_v3  ;;  %v320_v59 = vmul.f32 -0.5, %v713_v3  ;;  %v323_v10 = vand.u32 2147483647, %v713_v3 }
  0x85   :  { %v289_v56 = vsel %vm288_vm11, %v286_v52, %v283_v58  ;;  %v313_v6 = vmul.f32 %v709_v43, %v312_v49 }
  0x86   :  { %v337_v55 = vadd.f32 %v289_v56, %v113_v24  ;;  %720 = vlog2.f32 %v317_v22  ;;  %v321_v30 = vadd.f32 1.0, %v320_v59  ;;  %vm324_vm15 = vcmp.lt.f32.partialorder %v323_v10, 0.0004427343 }
  0x88   :  { %v715_v5 = vpop.eup %714  ;;  %v385_v46 = vmul.f32 %v369_v50, %v337_v55  ;;  %v322_v7 = vmul.f32 %v713_v3, %v321_v30 }
  0x89   :  { %v292_v25 = vmul.f32 0.6931472, %v715_v5 }
  0x8a   :  { %v717_v20 = vpop.eup %716  ;;  %v401_v21 = vadd.f32 %v385_v46, %v353_v47 }
  0x8b   :  { %v298_v9 = vsel %vm297_vm12, %v295_v63, %v292_v25  ;;  %v301_v26 = vmul.f32 0.6931472, %v717_v20 }
  0x8c   :  { %417 = vst [vmem:[#allocation3 + $0x38] sm:$0xff] %v401_v21  ;;  %v338_v62 = vadd.f32 %v298_v9, %v114_v42 }
  0x8d   :  { %v307_v60 = vsel %vm306_vm13, %v304_v2, %v301_v26 }
  0x8e   :  { %v386_v31 = vmul.f32 %v370_v16, %v338_v62  ;;  %v339_v13 = vadd.f32 %v307_v60, %v115_v18 }
  0x90   :  { %v402_v44 = vadd.f32 %v386_v31, %v354_v29  ;;  %v387_v15 = vmul.f32 %v371_v39, %v339_v13  ;;  %v719_v37 = vpop.eup %718 }
  0x91   :  { %v310_v36 = vmul.f32 0.6931472, %v719_v37 }
  0x92   :  { %418 = vst [vmem:[#allocation3 + $0x60] sm:$0xff] %v402_v44  ;;  %v403_v48 = vadd.f32 %v387_v15, %v355_v14 }
  0x93   :  { %v721_v34 = vpop.eup %720  ;;  %v316_v19 = vsel %vm315_vm14, %v313_v6, %v310_v36 }
  0x94   :  { %419 = vst [vmem:[#allocation3 + $0x70] sm:$0xff] %v403_v48  ;;  %v340_v27 = vadd.f32 %v316_v19, %v116_v8  ;;  %v319_v61 = vmul.f32 0.6931472, %v721_v34 }
  0x96   :  { %v388_v11 = vmul.f32 %v372_v32, %v340_v27  ;;  %v325_v53 = vsel %vm324_vm15, %v322_v7, %v319_v61 }
  0x97   :  { %v341_v40 = vadd.f32 %v325_v53, %v117_v41 }
  0x98   :  { %v404_v12 = vadd.f32 %v388_v11, %v356_v33 }
  0x99   :  { %v389_v43 = vmul.f32 %v373_v1, %v341_v40 }
  0x9a   :  { %420 = vst [vmem:[#allocation3 + $0x78] sm:$0xff] %v404_v12 }
  0x9b   :  { %v405_v52 = vadd.f32 %v389_v43, %v357_v28 }
  0x9d   :  { %421 = vst [vmem:[#allocation3 + $0x28] sm:$0xff] %v405_v52 }
  0x9e PF:  { %p596_p7 = scmp.gt.s32.totalorder %s1126_s0, 0 }
  0xa0   :  { %425 = sbr.rel (%p596_p7) target bundleno = 174 (0xae), region = 49 }
  0xa5   :  { %v426_v54 = vld [vmem:[#allocation9] sm:$0xff]  ;;  %v427_v23 = vld [vmem:[#allocation9 + $0x8] sm:$0xff]  ;;  %v428_v38 = vld [vmem:[#allocation9 + $0x10] sm:$0xff] }
  0xa6   :  { %442 = vst [vmem:[#allocation3 + $0x30] sm:$0xff] %v426_v54  ;;  %443 = vst [vmem:[#allocation3] sm:$0xff] %v427_v23  ;;  %v429_v24 = vld [vmem:[#allocation9 + $0x18] sm:$0xff]  ;;  %v430_v35 = vld [vmem:[#allocation9 + $0x20] sm:$0xff] }
  0xa7   :  { %444 = vst [vmem:[#allocation3 + $0x58] sm:$0xff] %v428_v38  ;;  %v431_v58 = vld [vmem:[#allocation9 + $0x28] sm:$0xff]  ;;  %445 = vst [vmem:[#allocation3 + $0x18] sm:$0xff] %v429_v24  ;;  %v432_v4 = vld [vmem:[#allocation9 + $0x30] sm:$0xff] }
  0xa8   :  { %446 = vst [vmem:[#allocation3 + $0x50] sm:$0xff] %v430_v35  ;;  %447 = vst [vmem:[#allocation3 + $0x68] sm:$0xff] %v431_v58  ;;  %v433_v3 = vld [vmem:[#allocation9 + $0x38] sm:$0xff]  ;;  %v434_v17 = vld [vmem:[#allocation9 + $0x40] sm:$0xff] }
  0xa9   :  { %448 = vst [vmem:[#allocation3 + $0x8] sm:$0xff] %v432_v4  ;;  %449 = vst [vmem:[#allocation3 + $0x48] sm:$0xff] %v433_v3  ;;  %v435_v56 = vld [vmem:[#allocation9 + $0x48] sm:$0xff]  ;;  %v436_v50 = vld [vmem:[#allocation9 + $0x50] sm:$0xff] }
  0xaa   :  { %450 = vst [vmem:[#allocation3 + $0x40] sm:$0xff] %v434_v17  ;;  %v437_v45 = vld [vmem:[#allocation9 + $0x58] sm:$0xff]  ;;  %451 = vst [vmem:[#allocation3 + $0x20] sm:$0xff] %v435_v56  ;;  %v438_v22 = vld [vmem:[#allocation9 + $0x60] sm:$0xff] }
  0xab   :  { %452 = vst [vmem:[#allocation3 + $0x10] sm:$0xff] %v436_v50  ;;  %453 = vst [vmem:[#allocation3 + $0x38] sm:$0xff] %v437_v45  ;;  %v439_v55 = vld [vmem:[#allocation9 + $0x68] sm:$0xff]  ;;  %v440_v0 = vld [vmem:[#allocation9 + $0x70] sm:$0xff] }
  0xac   :  { %454 = vst [vmem:[#allocation3 + $0x60] sm:$0xff] %v438_v22  ;;  %455 = vst [vmem:[#allocation3 + $0x70] sm:$0xff] %v439_v55  ;;  %v441_v47 = vld [vmem:[#allocation9 + $0x78] sm:$0xff] }
  0xad   :  { %456 = vst [vmem:[#allocation3 + $0x78] sm:$0xff] %v440_v0  ;;  %457 = vst [vmem:[#allocation3 + $0x28] sm:$0xff] %v441_v47 }
  0xae PF:  { %v1157_v63 = vmov 0.0   ;;  %vm841_vm0 = vmmov 0   ;;  %v463_v59 = vld [vmem:[#allocation3 + $0x18] sm:$0xff]  ;;  %v461_v49 = vld [vmem:[#allocation3] sm:$0xff]  ;;  %v460_v29 = vld [vmem:[#allocation3 + $0x30] sm:$0xff]  ;;  %v572_v34 = vlaneseq  ;;  %s842_s24 = smov [#allocation14]  }
  0xaf   :  { %614 = vmatprep.subr.mxu0 %v1157_v63  ;;  %646 = vmatprep.mubr.msk.f32.mxu0 %vm841_vm0, %v1157_v63  ;;  %v465_v16 = vld [vmem:[#allocation3 + $0x68] sm:$0xff]  ;;  %v464_v26 = vld [vmem:[#allocation3 + $0x50] sm:$0xff]  ;;  %v462_v62 = vld [vmem:[#allocation3 + $0x58] sm:$0xff]  ;;  %s584_s25 = sshll.u32 %s842_s24, 4  ;;  %s585_s25 = int_to_ptr.vmem [resolvable:$true] %s584_s25 }
  0xb0   :  { %v467_v18 = vld [vmem:[#allocation3 + $0x48] sm:$0xff]  ;;  %v459_v60 = vld [vmem:[#allocation6] sm:$0xff]  ;;  %v552_v39 = vld [vmem:[%s1131_s5 + $0x1] sm:$0x1]  ;;  %v573_v41 = vshrl.u32 %v572_v34, 7  ;;  %s806_s26 = scalar_lea.vmem %s585_s25, 128  ;;  %p811_p9 = scmp.lt.s32.totalorder %s585_s25, %s585_s25 }
  0xb1   :  { %v469_v20 = vld [vmem:[#allocation3 + $0x20] sm:$0xff]  ;;  %v466_v9 = vld [vmem:[#allocation3 + $0x8] sm:$0xff]  ;;  %v555_v51 = vand.u32 2147483647, %v552_v39  ;;  %v554_v48 = vmax.f32 %v552_v39, 0.0  ;;  %v458_v11 = vld [vmem:[#allocation2] sm:$0xff]  ;;  %p807_p8 = scmp.ne.s32.totalorder %s585_s25, %s806_s26  ;;  %p812_p10 = scmp.lt.s32.totalorder %s806_s26, %s806_s26 }
  0xb2   :  { %v471_v25 = vld [vmem:[#allocation3 + $0x38] sm:$0xff]  ;;  %v470_v2 = vld [vmem:[#allocation3 + $0x10] sm:$0xff]  ;;  %v468_v21 = vld [vmem:[#allocation3 + $0x40] sm:$0xff]  ;;  %v574_v33 = vsub.s32 0, %v573_v41 }
  0xb3   :  { %v473_v42 = vld [vmem:[#allocation3 + $0x70] sm:$0xff]  ;;  %v472_v57 = vld [vmem:[#allocation3 + $0x60] sm:$0xff]  ;;  %v556_v31 = vsub.f32 0.0, %v555_v51  ;;  %v553_v19 = vld [vmem:[%s1131_s5 + $0x2] sm:$0x1]  ;;  %p813_p11 = por %p812_p10, %p811_p9 }
  0xb4   :  { %v475_v5 = vld [vmem:[#allocation3 + $0x28] sm:$0xff]  ;;  %v474_v46 = vld [vmem:[#allocation3 + $0x78] sm:$0xff] }
  0xb5   :  { %615 = vmatpush3.xpose.msra.mxu0 %v475_v5  ;;  %v557_v13 = vmul.f32 1.442695, %v556_v31  ;;  %v551_v27 = vld [vmem:[%s1131_s5] sm:$0x1]  ;;  %p814_p12 = pnand %p813_p11, %p807_p8 }
  0xb6   :  { %616 = vmatprep.subr.mxu0 %v1157_v63 }
  0xb7   :  { %722 = vpow2.f32 %v557_v13 }
  0xb9   :  { %617 = vmatpush3.xpose.msra.mxu0 %v474_v46 }
  0xba   :  { %618 = vmatprep.subr.mxu0 %v1157_v63 }
  0xbd   :  { %619 = vmatpush3.xpose.msra.mxu0 %v473_v42 }
  0xbe   :  { %620 = vmatprep.subr.mxu0 %v1157_v63 }
  0xc1   :  { %621 = vmatpush3.xpose.msra.mxu0 %v472_v57 }
  0xc2   :  { %622 = vmatprep.subr.mxu0 %v1157_v63 }
  0xc4   :  { %v723_v14 = vpop.eup %722 }
  0xc5   :  { %623 = vmatpush3.xpose.msra.mxu0 %v471_v25  ;;  %v559_v30 = vadd.f32 1.0, %v723_v14  ;;  %v562_v44 = vmul.f32 -0.5, %v723_v14  ;;  %v565_v10 = vand.u32 2147483647, %v723_v14 }
  0xc6   :  { %624 = vmatprep.subr.mxu0 %v1157_v63 }
  0xc7   :  { %724 = vlog2.f32 %v559_v30  ;;  %v563_v15 = vadd.f32 1.0, %v562_v44  ;;  %vm566_vm1 = vcmp.lt.f32.partialorder %v565_v10, 0.0004427343 }
  0xc9   :  { %625 = vmatpush3.xpose.msra.mxu0 %v470_v2  ;;  %v564_v8 = vmul.f32 %v723_v14, %v563_v15 }
  0xca   :  { %626 = vmatprep.subr.mxu0 %v1157_v63 }
  0xcd   :  { %627 = vmatpush3.xpose.msra.mxu0 %v469_v20 }
  0xce   :  { %628 = vmatprep.subr.mxu0 %v1157_v63 }
  0xd1   :  { %629 = vmatpush3.xpose.msra.mxu0 %v468_v21 }
  0xd2   :  { %630 = vmatprep.subr.mxu0 %v1157_v63 }
  0xd4   :  { %v725_v6 = vpop.eup %724 }
  0xd5   :  { %631 = vmatpush3.xpose.msra.mxu0 %v467_v18  ;;  %v561_v37 = vmul.f32 0.6931472, %v725_v6 }
  0xd6   :  { %632 = vmatprep.subr.mxu0 %v1157_v63 }
  0xd7   :  { %v567_v36 = vsel %vm566_vm1, %v564_v8, %v561_v37 }
  0xd8   :  { %v568_v7 = vadd.f32 %v567_v36, %v554_v48 }
  0xd9   :  { %633 = vmatpush3.xpose.msra.mxu0 %v466_v9 }
  0xda   :  { %634 = vmatprep.subr.mxu0 %v1157_v63  ;;  %v569_v32 = vmul.f32 %v568_v7, %v553_v19 }
  0xdc   :  { %v570_v61 = vadd.f32 %v569_v32, %v551_v27 }
  0xdd   :  { %635 = vmatpush3.xpose.msra.mxu0 %v465_v16 }
  0xde   :  { %636 = vmatprep.subr.mxu0 %v1157_v63  ;;  %v575_v53 = vrot.slane %v570_v61, %v574_v33 }
  0xe1   :  { %637 = vmatpush3.xpose.msra.mxu0 %v464_v26 }
  0xe2   :  { %638 = vmatprep.subr.mxu0 %v1157_v63 }
  0xe5   :  { %639 = vmatpush3.xpose.msra.mxu0 %v463_v59 }
  0xe6   :  { %640 = vmatprep.subr.mxu0 %v1157_v63 }
  0xe9   :  { %641 = vmatpush3.xpose.msra.mxu0 %v462_v62 }
  0xea   :  { %642 = vmatprep.subr.mxu0 %v1157_v63 }
  0xed   :  { %643 = vmatpush3.xpose.msra.mxu0 %v461_v49 }
  0xee   :  { %644 = vmatprep.subr.mxu0 %v1157_v63 }
  0xf1   :  { %645 = vmatpush3.xpose.msra.mxu0 %v460_v29 }
  0xf4   :  { %647 = vmatmul.mubr.f32.vlgmr.msra.gmra.mxu0 %v459_v60 }
 0x1b4   :  { %v542_v1 = vpop.f32.mrf.mxu0 }
 0x1b5   :  { %v546_v40 = vadd.f32 %v542_v1, %v458_v11 }
 0x1b6   :  { %v648_v12 = vpop.f32.mrf.mxu0 }
 0x1b7   :  { %547 = vst [vmem:[#allocation2] sm:$0xff] %v546_v40  ;;  %v576_v28 = vadd.f32 %v575_v53, %v546_v40 }
 0x1b9   :  { %577 = vst [vmem:[#allocation14] sm:$0xff] %v576_v28 }
 0x1ba   :  { %817 = shalt.err (!%p814_p12)
}
 0x1bb   :  { %587 = dma.vmem_to_hbm [thread:$0]  %s585_s25, 128, %s1132_s6, [#allocation8]  }
 0x1bc   :  { %832 = dma.done.wait [#allocation8], 128  }
 0x1bd   :  { %833 = vsyncadd [#allocation8], 4294967168 }
 0x1be   :  { %591 = vsyncpa [#allocation7], 1 }
 0x1bf   :  { %592 = vsyncpa [#allocation10], 1 }
 0x1c0   :  { %593 = vsyncpa [#allocation13], 1 }
 0x1c1   :  { %594 = vsyncpa [#allocation8], 1 }

</bundles_post_ra>
